<compile_context>
chip_gen: v7x
topology: tpu7x:2x2x1
jax: 0.10.0
libtpu: 0.0.40
codegen_flags: <defaults>
</compile_context>

<pallas_src>
import functools

import jax
import jax.numpy as jnp
from jax.experimental import pallas as pl
from jax.experimental.pallas import tpu as pltpu

# Large finite negative: exp() underflows to exactly 0, no inf/NaN arithmetic.
_MASK_VALUE = -1e30


def _fast_recip(x):
    """EUP vrcp (approx) + one Newton step -> ~f32 accuracy, cheaper than divide."""
    r = pl.reciprocal(x, approx=True)
    return r * (2.0 - x * r)


def _neg_soft_loss_kernel(s_ref, t_ref, o_ref, *, scaling, inv_temp,
                          final_scale, global_batch):
    i = pl.program_id(0)

    @pl.when(i == 0)
    def _init():
        o_ref[...] = jnp.zeros_like(o_ref)

    s = s_ref[...].astype(jnp.float32)  # (TB, N); column 0 is the positive score
    t = t_ref[...].astype(jnp.float32)
    tb, n = s.shape

    # In-kernel masks: drop column 0 (positive score) and any padded rows of a
    # ragged last batch tile.
    col = jax.lax.broadcasted_iota(jnp.int32, (tb, n), 1)
    col_valid = col >= 1
    row = jax.lax.broadcasted_iota(jnp.int32, (tb, n), 0)
    row_valid = (i * tb + row) < global_batch

    def softmax_weights(x):
        xm = jnp.where(col_valid, x, _MASK_VALUE)
        m = jnp.max(xm, axis=1, keepdims=True)
        e = jnp.exp(xm - m)
        return e * _fast_recip(jnp.sum(e, axis=1, keepdims=True))

    def log_softmax(x):
        xm = jnp.where(col_valid, x, _MASK_VALUE)
        m = jnp.max(xm, axis=1, keepdims=True)
        z = xm - m
        se = jnp.sum(jnp.exp(z), axis=1, keepdims=True)
        return z - jnp.log(se)

    def log_softmax_and_prob(x):  # fused: reuses e for p_t (one exp pass saved)
        xm = jnp.where(col_valid, x, _MASK_VALUE)
        m = jnp.max(xm, axis=1, keepdims=True)
        z = xm - m
        e = jnp.exp(z)
        se = jnp.sum(e, axis=1, keepdims=True)
        return z - jnp.log(se), e * _fast_recip(se)

    # Self-adversarial weighting of the negative scores (weights are detached
    # in the PyTorch code -> identical forward values).
    x_s = softmax_weights(scaling * s) * s
    x_t = softmax_weights(scaling * t) * t

    # KD-style KL with temperature (teacher = target distribution).
    log_ps = log_softmax(x_s * inv_temp)
    log_pt, p_t = log_softmax_and_prob(x_t * inv_temp)

    summand = p_t * (log_pt - log_ps)
    summand = jnp.where(jnp.logical_and(col_valid, row_valid), summand, 0.0)
    o_ref[...] = o_ref[...] + jnp.sum(summand)

    @pl.when(i == pl.num_programs(0) - 1)
    def _finalize():
        o_ref[...] = o_ref[...] * final_scale  # * T^2 / global batch size


def dmutde_neg_soft_loss(student_scores, teacher_scores, *, scaling=1.0,
                         temperature=2.0, block_rows=None):
    """student_scores, teacher_scores: [B, N]; column 0 is the positive score."""
    assert student_scores.shape == teacher_scores.shape
    B, N = student_scores.shape
    itemsize = jnp.dtype(student_scores.dtype).itemsize

    if block_rows is None:
        # Keep 2 inputs x 2 pipeline buffers x (TB*N*itemsize) well under the
        # default scoped-VMEM limit of every generation (incl. v7x's 64 MiB
        # physical / 32 MiB scoped): ~2 MiB per input block.
        budget_bytes_per_block = 2 * 1024 * 1024
        max_rows = max(8, budget_bytes_per_block // max(1, N * itemsize))
    else:
        max_rows = max(1, int(block_rows))

    if B <= max_rows:
        tb = B                                # single block: full dim is legal
    else:
        tb = max(8, (max_rows // 8) * 8)      # tiled: keep sublane-aligned
    num_tiles = pl.cdiv(B, tb)

    kernel = functools.partial(
        _neg_soft_loss_kernel,
        scaling=float(scaling),
        inv_temp=float(1.0 / temperature),
        final_scale=float(temperature * temperature / B),
        global_batch=B,
    )

    cost = pl.CostEstimate(
        flops=int(15 * B * N),
        transcendentals=int(6 * B * N),
        bytes_accessed=int(2 * B * N * itemsize + 4),
    )

    out = pl.pallas_call(
        kernel,
        out_shape=jax.ShapeDtypeStruct((1, 1), jnp.float32),
        grid_spec=pltpu.PrefetchScalarGridSpec(
            num_scalar_prefetch=0,
            grid=(num_tiles,),
            in_specs=[
                pl.BlockSpec((tb, N), lambda i: (i, 0)),
                pl.BlockSpec((tb, N), lambda i: (i, 0)),
            ],
            out_specs=pl.BlockSpec((1, 1), lambda i: (0, 0)),
        ),
        compiler_params=pltpu.CompilerParams(
            dimension_semantics=("arbitrary",),
        ),
        cost_estimate=cost,
    )(student_scores, teacher_scores)
    return out[0, 0]


def _reference(student_scores, teacher_scores, scaling=1.0, temperature=2.0):
    neg_s = student_scores[:, 1:].astype(jnp.float32)
    neg_t = teacher_scores[:, 1:].astype(jnp.float32)
    x_s = jax.nn.softmax(scaling * neg_s, axis=1) * neg_s
    x_t = jax.nn.softmax(scaling * neg_t, axis=1) * neg_t
    log_ps = jax.nn.log_softmax(x_s / temperature, axis=1)
    log_pt = jax.nn.log_softmax(x_t / temperature, axis=1)
    p_t = jnp.exp(log_pt)
    kl = jnp.sum(p_t * (log_pt - log_ps))
    return kl * temperature ** 2 / neg_s.shape[0]


if __name__ == "__main__":
    key = jax.random.PRNGKey(0)
    k1, k2, k3, k4 = jax.random.split(key, 4)

    # Case 1: tiny single-block case (1 positive + 16 negatives per query).
    B1, N1 = 4, 17
    s1 = jax.random.normal(k1, (B1, N1), dtype=jnp.float32)
    t1 = jax.random.normal(k2, (B1, N1), dtype=jnp.float32)
    out1 = jax.block_until_ready(
        dmutde_neg_soft_loss(s1, t1, scaling=1.0, temperature=2.0))
    ref1 = _reference(s1, t1, 1.0, 2.0)
    assert jnp.allclose(out1, ref1, atol=1e-4, rtol=1e-4), (out1, ref1)

    # Case 2: batch-tiled path with a ragged last tile (exercises the grid,
    # the cross-step accumulator and the padded-row mask).
    B2, N2 = 20, 33
    s2 = jax.random.normal(k3, (B2, N2), dtype=jnp.float32)
    t2 = jax.random.normal(k4, (B2, N2), dtype=jnp.float32)
    out2 = jax.block_until_ready(
        dmutde_neg_soft_loss(s2, t2, scaling=1.0, temperature=2.0, block_rows=8))
    ref2 = _reference(s2, t2, 1.0, 2.0)
    assert jnp.allclose(out2, ref2, atol=1e-4, rtol=1e-4), (out2, ref2)

    # Case 3: bf16 inputs go straight in (kernel upcasts; halves HBM traffic).
    s3 = s2.astype(jnp.bfloat16)
    t3 = t2.astype(jnp.bfloat16)
    out3 = jax.block_until_ready(
        dmutde_neg_soft_loss(s3, t3, scaling=1.0, temperature=2.0))
    ref3 = _reference(s3, t3, 1.0, 2.0)
    assert jnp.allclose(out3, ref3, atol=1e-3, rtol=1e-3), (out3, ref3)

    print("KERNEL_OK")
</pallas_src>

<mosaic_0001>
module attributes {stable_mosaic.version = 11 : i64} {
  func.func @_neg_soft_loss_kernel(%arg0: i32, %arg1: memref<4x17xf32, #tpu.memory_space<vmem>>, %arg2: memref<4x17xf32, #tpu.memory_space<vmem>>, %arg3: memref<1x1xf32, #tpu.memory_space<vmem>>) attributes {dimension_semantics = [#tpu.dimension_semantics<arbitrary>], iteration_bounds = array<i64: 1>, scalar_prefetch = 0 : i64, scratch_operands = 0 : i64, tpu.core_type = #tpu.core_type<tc>, window_params = [{transform_indices = @transform_0, window_bounds = array<i64: 4, 17>}, {transform_indices = @transform_1, window_bounds = array<i64: 4, 17>}, {pipeline_mode = #tpu.pipeline_mode<synchronous>, transform_indices = @transform_2, window_bounds = array<i64: 1, 1>}]} {
    %c0_i32 = arith.constant 0 : i32
    %0 = arith.cmpi eq, %arg0, %c0_i32 : i32
    %1 = arith.extui %0 : i1 to i32
    %c0_i32_0 = arith.constant 0 : i32
    %2 = arith.cmpi ne, %1, %c0_i32_0 : i32
    scf.if %2 {
      %cst_31 = arith.constant 0.000000e+00 : f32
      %103 = vector.broadcast %cst_31 : f32 to vector<1x1xf32>
      %c0_32 = arith.constant 0 : index
      %c0_33 = arith.constant 0 : index
      %104 = vector.load %arg3[%c0_32, %c0_33] : memref<1x1xf32, #tpu.memory_space<vmem>>, vector<1x1xf32>
      tpu.vector_store %arg3[%c0_32, %c0_33], %103 {strides = array<i32>} : memref<1x1xf32, #tpu.memory_space<vmem>>, vector<1x1xf32>,
    } else {
    }
    %c0 = arith.constant 0 : index
    %c0_1 = arith.constant 0 : index
    %3 = vector.load %arg1[%c0, %c0_1] : memref<4x17xf32, #tpu.memory_space<vmem>>, vector<4x17xf32>
    %c0_2 = arith.constant 0 : index
    %c0_3 = arith.constant 0 : index
    %4 = vector.load %arg2[%c0_2, %c0_3] : memref<4x17xf32, #tpu.memory_space<vmem>>, vector<4x17xf32>
    %5 = tpu.iota {dimensions = array<i32: 1>} : vector<4x17xi32>
    %c1_i32 = arith.constant 1 : i32
    %6 = vector.broadcast %c1_i32 : i32 to vector<4x17xi32>
    %7 = arith.cmpi sge, %5, %6 : vector<4x17xi32>
    %8 = tpu.iota {dimensions = array<i32: 0>} : vector<4x17xi32>
    %c4_i32 = arith.constant 4 : i32
    %9 = arith.muli %arg0, %c4_i32 : i32
    %10 = vector.broadcast %9 : i32 to vector<4x17xi32>
    %11 = arith.addi %10, %8 : vector<4x17xi32>
    %c4_i32_4 = arith.constant 4 : i32
    %12 = vector.broadcast %c4_i32_4 : i32 to vector<4x17xi32>
    %13 = arith.cmpi slt, %11, %12 : vector<4x17xi32>
    %cst = arith.constant 1.000000e+00 : f32
    %14 = vector.broadcast %cst : f32 to vector<4x17xf32>
    %15 = arith.mulf %14, %3 : vector<4x17xf32>
    %cst_5 = arith.constant -1.000000e+30 : f32
    %16 = vector.broadcast %cst_5 : f32 to vector<4x17xf32>
    %17 = arith.select %7, %15, %16 : vector<4x17xi1>, vector<4x17xf32>
    %cst_6 = arith.constant dense<0xFF800000> : vector<4xf32>
    %18 = vector.multi_reduction <maximumf>, %17, %cst_6 [1] : vector<4x17xf32> to vector<4xf32>
    %19 = vector.shape_cast %18 : vector<4xf32> to vector<4x1xf32>
    %20 = vector.broadcast %19 : vector<4x1xf32> to vector<4x17xf32>
    %21 = arith.subf %17, %20 : vector<4x17xf32>
    %22 = math.exp %21 : vector<4x17xf32>
    %cst_7 = arith.constant dense<0.000000e+00> : vector<4xf32>
    %23 = vector.multi_reduction <add>, %22, %cst_7 [1] : vector<4x17xf32> to vector<4xf32>
    %24 = vector.shape_cast %23 : vector<4xf32> to vector<4x1xf32>
    %25 = tpu.reciprocal %24 {approx = true} : vector<4x1xf32> -> vector<4x1xf32>
    %26 = arith.mulf %24, %25 : vector<4x1xf32>
    %cst_8 = arith.constant 2.000000e+00 : f32
    %27 = vector.broadcast %cst_8 : f32 to vector<4x1xf32>
    %28 = arith.subf %27, %26 : vector<4x1xf32>
    %29 = arith.mulf %25, %28 : vector<4x1xf32>
    %30 = vector.broadcast %29 : vector<4x1xf32> to vector<4x17xf32>
    %31 = arith.mulf %22, %30 : vector<4x17xf32>
    %32 = arith.mulf %31, %3 : vector<4x17xf32>
    %cst_9 = arith.constant 1.000000e+00 : f32
    %33 = vector.broadcast %cst_9 : f32 to vector<4x17xf32>
    %34 = arith.mulf %33, %4 : vector<4x17xf32>
    %cst_10 = arith.constant -1.000000e+30 : f32
    %35 = vector.broadcast %cst_10 : f32 to vector<4x17xf32>
    %36 = arith.select %7, %34, %35 : vector<4x17xi1>, vector<4x17xf32>
    %cst_11 = arith.constant dense<0xFF800000> : vector<4xf32>
    %37 = vector.multi_reduction <maximumf>, %36, %cst_11 [1] : vector<4x17xf32> to vector<4xf32>
    %38 = vector.shape_cast %37 : vector<4xf32> to vector<4x1xf32>
    %39 = vector.broadcast %38 : vector<4x1xf32> to vector<4x17xf32>
    %40 = arith.subf %36, %39 : vector<4x17xf32>
    %41 = math.exp %40 : vector<4x17xf32>
    %cst_12 = arith.constant dense<0.000000e+00> : vector<4xf32>
    %42 = vector.multi_reduction <add>, %41, %cst_12 [1] : vector<4x17xf32> to vector<4xf32>
    %43 = vector.shape_cast %42 : vector<4xf32> to vector<4x1xf32>
    %44 = tpu.reciprocal %43 {approx = true} : vector<4x1xf32> -> vector<4x1xf32>
    %45 = arith.mulf %43, %44 : vector<4x1xf32>
    %cst_13 = arith.constant 2.000000e+00 : f32
    %46 = vector.broadcast %cst_13 : f32 to vector<4x1xf32>
    %47 = arith.subf %46, %45 : vector<4x1xf32>
    %48 = arith.mulf %44, %47 : vector<4x1xf32>
    %49 = vector.broadcast %48 : vector<4x1xf32> to vector<4x17xf32>
    %50 = arith.mulf %41, %49 : vector<4x17xf32>
    %51 = arith.mulf %50, %4 : vector<4x17xf32>
    %cst_14 = arith.constant 5.000000e-01 : f32
    %52 = vector.broadcast %cst_14 : f32 to vector<4x17xf32>
    %53 = arith.mulf %32, %52 : vector<4x17xf32>
    %cst_15 = arith.constant -1.000000e+30 : f32
    %54 = vector.broadcast %cst_15 : f32 to vector<4x17xf32>
    %55 = arith.select %7, %53, %54 : vector<4x17xi1>, vector<4x17xf32>
    %cst_16 = arith.constant dense<0xFF800000> : vector<4xf32>
    %56 = vector.multi_reduction <maximumf>, %55, %cst_16 [1] : vector<4x17xf32> to vector<4xf32>
    %57 = vector.shape_cast %56 : vector<4xf32> to vector<4x1xf32>
    %58 = vector.broadcast %57 : vector<4x1xf32> to vector<4x17xf32>
    %59 = arith.subf %55, %58 : vector<4x17xf32>
    %60 = math.exp %59 : vector<4x17xf32>
    %cst_17 = arith.constant dense<0.000000e+00> : vector<4xf32>
    %61 = vector.multi_reduction <add>, %60, %cst_17 [1] : vector<4x17xf32> to vector<4xf32>
    %62 = vector.shape_cast %61 : vector<4xf32> to vector<4x1xf32>
    %63 = math.log %62 : vector<4x1xf32>
    %64 = vector.broadcast %63 : vector<4x1xf32> to vector<4x17xf32>
    %65 = arith.subf %59, %64 : vector<4x17xf32>
    %cst_18 = arith.constant 5.000000e-01 : f32
    %66 = vector.broadcast %cst_18 : f32 to vector<4x17xf32>
    %67 = arith.mulf %51, %66 : vector<4x17xf32>
    %cst_19 = arith.constant -1.000000e+30 : f32
    %68 = vector.broadcast %cst_19 : f32 to vector<4x17xf32>
    %69 = arith.select %7, %67, %68 : vector<4x17xi1>, vector<4x17xf32>
    %cst_20 = arith.constant dense<0xFF800000> : vector<4xf32>
    %70 = vector.multi_reduction <maximumf>, %69, %cst_20 [1] : vector<4x17xf32> to vector<4xf32>
    %71 = vector.shape_cast %70 : vector<4xf32> to vector<4x1xf32>
    %72 = vector.broadcast %71 : vector<4x1xf32> to vector<4x17xf32>
    %73 = arith.subf %69, %72 : vector<4x17xf32>
    %74 = math.exp %73 : vector<4x17xf32>
    %cst_21 = arith.constant dense<0.000000e+00> : vector<4xf32>
    %75 = vector.multi_reduction <add>, %74, %cst_21 [1] : vector<4x17xf32> to vector<4xf32>
    %76 = vector.shape_cast %75 : vector<4xf32> to vector<4x1xf32>
    %77 = math.log %76 : vector<4x1xf32>
    %78 = vector.broadcast %77 : vector<4x1xf32> to vector<4x17xf32>
    %79 = arith.subf %73, %78 : vector<4x17xf32>
    %80 = tpu.reciprocal %76 {approx = true} : vector<4x1xf32> -> vector<4x1xf32>
    %81 = arith.mulf %76, %80 : vector<4x1xf32>
    %cst_22 = arith.constant 2.000000e+00 : f32
    %82 = vector.broadcast %cst_22 : f32 to vector<4x1xf32>
    %83 = arith.subf %82, %81 : vector<4x1xf32>
    %84 = arith.mulf %80, %83 : vector<4x1xf32>
    %85 = vector.broadcast %84 : vector<4x1xf32> to vector<4x17xf32>
    %86 = arith.mulf %74, %85 : vector<4x17xf32>
    %87 = arith.subf %79, %65 : vector<4x17xf32>
    %88 = arith.mulf %86, %87 : vector<4x17xf32>
    %89 = arith.andi %7, %13 : vector<4x17xi1>
    %cst_23 = arith.constant 0.000000e+00 : f32
    %90 = vector.broadcast %cst_23 : f32 to vector<4x17xf32>
    %91 = arith.select %89, %88, %90 : vector<4x17xi1>, vector<4x17xf32>
    %c0_24 = arith.constant 0 : index
    %c0_25 = arith.constant 0 : index
    %92 = vector.load %arg3[%c0_24, %c0_25] : memref<1x1xf32, #tpu.memory_space<vmem>>, vector<1x1xf32>
    %93 = vector.shape_cast %91 : vector<4x17xf32> to vector<1x4x17xf32>
    %cst_26 = arith.constant dense<0.000000e+00> : vector<1xf32>
    %94 = vector.multi_reduction <add>, %93, %cst_26 [1, 2] : vector<1x4x17xf32> to vector<1xf32>
    %95 = vector.shape_cast %94 : vector<1xf32> to vector<1x1x1xf32>
    %96 = vector.extract %95[0, 0, 0] : f32 from vector<1x1x1xf32>
    %97 = vector.broadcast %96 : f32 to vector<1x1xf32>
    %98 = arith.addf %92, %97 : vector<1x1xf32>
    %c0_27 = arith.constant 0 : index
    %c0_28 = arith.constant 0 : index
    %99 = vector.load %arg3[%c0_27, %c0_28] : memref<1x1xf32, #tpu.memory_space<vmem>>, vector<1x1xf32>
    tpu.vector_store %arg3[%c0_27, %c0_28], %98 {strides = array<i32>} : memref<1x1xf32, #tpu.memory_space<vmem>>, vector<1x1xf32>,
    %c0_i32_29 = arith.constant 0 : i32
    %100 = arith.cmpi eq, %arg0, %c0_i32_29 : i32
    %101 = arith.extui %100 : i1 to i32
    %c0_i32_30 = arith.constant 0 : i32
    %102 = arith.cmpi ne, %101, %c0_i32_30 : i32
    scf.if %102 {
      %c0_31 = arith.constant 0 : index
      %c0_32 = arith.constant 0 : index
      %103 = vector.load %arg3[%c0_31, %c0_32] : memref<1x1xf32, #tpu.memory_space<vmem>>, vector<1x1xf32>
      %cst_33 = arith.constant 1.000000e+00 : f32
      %104 = vector.broadcast %cst_33 : f32 to vector<1x1xf32>
      %105 = arith.mulf %103, %104 : vector<1x1xf32>
      %c0_34 = arith.constant 0 : index
      %c0_35 = arith.constant 0 : index
      %106 = vector.load %arg3[%c0_34, %c0_35] : memref<1x1xf32, #tpu.memory_space<vmem>>, vector<1x1xf32>
      tpu.vector_store %arg3[%c0_34, %c0_35], %105 {strides = array<i32>} : memref<1x1xf32, #tpu.memory_space<vmem>>, vector<1x1xf32>,
    } else {
    }
    return
  }
  func.func @transform_0(%arg0: i32) -> (i32, i32) {
    %c0_i32 = arith.constant 0 : i32
    %c0_i32_0 = arith.constant 0 : i32
    return %arg0, %c0_i32 : i32, i32
  }
  func.func @transform_1(%arg0: i32) -> (i32, i32) {
    %c0_i32 = arith.constant 0 : i32
    %c0_i32_0 = arith.constant 0 : i32
    return %arg0, %c0_i32 : i32, i32
  }
  func.func @transform_2(%arg0: i32) -> (i32, i32) {
    %c0_i32 = arith.constant 0 : i32
    %c0_i32_0 = arith.constant 0 : i32
    %c0_i32_1 = arith.constant 0 : i32
    return %c0_i32, %c0_i32_0 : i32, i32
  }
}

</mosaic_0001>

<bundles_post_ra>
// kernel: tpu_custom_call.1
= control target key start
LH: loop header
LB: loop body
LE: loop exit
PB: predicated region body
PF: predicated region fallthrough
CT: control target
= control target key end

     0   :  { %7 = vsyncpa [#allocation3], 0  ;;  %s337_s0 = inlined_call_operand.hbm [shape: f32[4,17], index: 0, kind: input, shape index: {}]   ;;  %s338_s1 = inlined_call_operand.hbm [shape: f32[4,17], index: 1, kind: input, shape index: {}]   ;;  %s339_s2 = inlined_call_operand.hbm [shape: f32[1,1], index: 2, kind: output, shape index: {}]  }
   0x1   :  { %8 = vsyncpa [#allocation6], 0 }
   0x2   :  { %9 = vsyncpa [#allocation4], 0  ;;  %s255_s9 = smov [#allocation2]   ;;  %s256_s11 = smov [#allocation5]  }
   0x3   :  { %s16_s10 = sshll.u32 %s255_s9, 4  ;;  %s26_s12 = sshll.u32 %s256_s11, 4  ;;  %s17_s10 = int_to_ptr.vmem [resolvable:$true] %s16_s10  ;;  %s27_s12 = int_to_ptr.vmem [resolvable:$true] %s26_s12 }
   0x4   :  { %s183_s15 = scalar_lea.hbm %s337_s0, 64 }
   0x5   :  { %p184_p0 = scmp.ne.s32.totalorder %s337_s0, %s183_s15  ;;  %p187_p1 = scmp.lt.u32.totalorder %s183_s15, %s337_s0 }
   0x7   :  { %p189_p2 = pnand %p187_p1, %p184_p0 }
   0x9   :  { %192 = shalt.err (!%p189_p2)
}
   0xa   :  { %s193_s20 = scalar_lea.vmem %s17_s10, 64  ;;  %p198_p4 = scmp.lt.s32.totalorder %s17_s10, %s17_s10 }
   0xb   :  { %p194_p3 = scmp.ne.s32.totalorder %s17_s10, %s193_s20  ;;  %p199_p5 = scmp.lt.s32.totalorder %s193_s20, %s193_s20 }
   0xd   :  { %p200_p6 = por %p199_p5, %p198_p4 }
   0xf   :  { %p201_p7 = pnand %p200_p6, %p194_p3 }
  0x11   :  { %204 = shalt.err (!%p201_p7)
}
  0x12   :  { %19 = dma.hbm_to_vmem [thread:$0]  %s337_s0, 64, %s17_s10, [#allocation3]  }
  0x13   :  { %s205_s25 = scalar_lea.hbm %s338_s1, 64 }
  0x14   :  { %p206_p8 = scmp.ne.s32.totalorder %s338_s1, %s205_s25  ;;  %p209_p9 = scmp.lt.u32.totalorder %s205_s25, %s338_s1 }
  0x16   :  { %p211_p10 = pnand %p209_p9, %p206_p8 }
  0x18   :  { %214 = shalt.err (!%p211_p10)
}
  0x19   :  { %s215_s30 = scalar_lea.vmem %s27_s12, 64  ;;  %p220_p12 = scmp.lt.s32.totalorder %s27_s12, %s27_s12 }
  0x1a   :  { %p216_p11 = scmp.ne.s32.totalorder %s27_s12, %s215_s30  ;;  %p221_p13 = scmp.lt.s32.totalorder %s215_s30, %s215_s30 }
  0x1c   :  { %p222_p0 = por %p221_p13, %p220_p12 }
  0x1e   :  { %p223_p1 = pnand %p222_p0, %p216_p11 }
  0x20   :  { %226 = shalt.err (!%p223_p1)
}
  0x21   :  { %29 = dma.hbm_to_vmem [thread:$0]  %s338_s1, 64, %s27_s12, [#allocation6]  }
  0x22   :  { %249 = dma.done.wait [#allocation3], 64  }
  0x23   :  { %250 = vsyncadd [#allocation3], 4294967232 }
  0x24   :  { %251 = dma.done.wait [#allocation6], 64  }
  0x25   :  { %252 = vsyncadd [#allocation6], 4294967232  ;;  %v44_v0 = vlaneseq  ;;  %vm54_vm1 = vcmask 134144   ;;  %v43_v2 = vld [vmem:[#allocation5] sm:$0xf]  ;;  %vm40_vm4 = vcmask 0  }
  0x26   :  { %v42_v3 = vld [vmem:[#allocation2] sm:$0xf]  ;;  %s258_s4 = smov [#allocation7]  }
  0x27   :  { %v299_v1 = vand.u32 127, %v44_v0  ;;  %v48_v54 = vshrl.u32 %v44_v0, 7  ;;  %s149_s5 = sshll.u32 %s258_s4, 4  ;;  %s150_s5 = int_to_ptr.vmem [resolvable:$true] %s149_s5 }
  0x28   :  { %s227_s6 = scalar_lea.vmem %s150_s5, 16  ;;  %s231_s7 = scalar_lea.vmem %s150_s5, 32 }
  0x29   :  { %vm46_vm0 = vcmp.ge.s32.totalorder %v299_v1, 1  ;;  %vm52_vm2 = vcmp.lt.s32.totalorder %v48_v54, 4  ;;  %p228_p2 = scmp.ne.s32.totalorder %s150_s5, %s227_s6  ;;  %p232_p3 = scmp.lt.s32.totalorder %s150_s5, %s150_s5 }
  0x2a   :  { %v70_v4 = vsel %vm46_vm0, %v43_v2, -1e+30  ;;  %v53_v5 = vsel %vm46_vm0, %v42_v3, -1e+30  ;;  %vm121_vm3 = vmand %vm46_vm0, %vm52_vm2  ;;  %p233_p4 = scmp.lt.s32.totalorder %s231_s7, %s227_s6 }
  0x2b   :  { %v71_v6 = vsel %vm54_vm1, %v70_v4, -inf  ;;  %v55_v7 = vsel %vm54_vm1, %v53_v5, -inf }
  0x2c   :  { %72 = vmax.xlane.f32.xlu0 %v71_v6  ;;  %p234_p5 = por %p233_p4, %p232_p3 }
  0x2e   :  { %p235_p6 = pnand %p234_p5, %p228_p2 }
  0x30   :  { %56 = vmax.xlane.f32.xlu0 %v55_v7 }
  0xb9   :  { %v73_v8 = vpop.xlane.xlu0 %72 }
  0xba   :  { %v74_v9 = vsub.f32 %v70_v4, %v73_v8  ;;  %v257_v4 = vmov 0.0  }
  0xbb   :  { %41 = vst.msk [vmem:[#allocation7] sm:$0x1] %vm40_vm4, %v257_v4 }
  0xbc   :  { %v75_v10 = vmul.f32 1.442695, %v74_v9 }
  0xbd   :  { %v57_v11 = vpop.xlane.xlu0 %56 }
  0xbe   :  { %165 = vpow2.f32 %v75_v10  ;;  %v58_v12 = vsub.f32 %v53_v5, %v57_v11 }
  0xc0   :  { %v59_v13 = vmul.f32 1.442695, %v58_v12 }
  0xc2   :  { %167 = vpow2.f32 %v59_v13  ;;  %v123_v11 = vld [vmem:[#allocation7] sm:$0x1] }
  0xc8   :  { %v166_v14 = vpop.eup %165 }
  0xc9   :  { %v77_v15 = vsel %vm54_vm1, %v166_v14, 0.0 }
  0xca   :  { %78 = vadd.xlane.f32.xlu1 %v77_v15 }
  0xcc   :  { %v168_v16 = vpop.eup %167 }
  0xcd   :  { %v61_v17 = vsel %vm54_vm1, %v168_v16, 0.0 }
  0xce   :  { %62 = vadd.xlane.f32.xlu1 %v61_v17 }
 0x157   :  { %v79_v18 = vpop.xlane.xlu1 %78 }
 0x158   :  { %169 = vrcp.f32 %v79_v18 }
 0x15b   :  { %v63_v19 = vpop.xlane.xlu1 %62 }
 0x15c   :  { %171 = vrcp.f32 %v63_v19 }
 0x162   :  { %v170_v20 = vpop.eup %169 }
 0x163   :  { %v81_v21 = vmul.f32 %v170_v20, %v79_v18 }
 0x165   :  { %v82_v22 = vsub.f32 2.0, %v81_v21 }
 0x166   :  { %v172_v23 = vpop.eup %171 }
 0x167   :  { %v83_v24 = vmul.f32 %v170_v20, %v82_v22  ;;  %v65_v25 = vmul.f32 %v172_v23, %v63_v19 }
 0x169   :  { %v66_v26 = vsub.f32 2.0, %v65_v25  ;;  %v84_v27 = vmul.f32 %v166_v14, %v83_v24 }
 0x16b   :  { %v67_v28 = vmul.f32 %v172_v23, %v66_v26  ;;  %v85_v29 = vmul.f32 %v84_v27, %v43_v2 }
 0x16d   :  { %v100_v30 = vmul.f32 0.5, %v85_v29  ;;  %v68_v31 = vmul.f32 %v168_v16, %v67_v28 }
 0x16f   :  { %v101_v32 = vsel %vm46_vm0, %v100_v30, -1e+30  ;;  %v69_v33 = vmul.f32 %v68_v31, %v42_v3 }
 0x170   :  { %v102_v34 = vsel %vm54_vm1, %v101_v32, -inf }
 0x171   :  { %103 = vmax.xlane.f32.xlu0 %v102_v34  ;;  %v86_v35 = vmul.f32 0.5, %v69_v33 }
 0x173   :  { %v87_v36 = vsel %vm46_vm0, %v86_v35, -1e+30 }
 0x174   :  { %v88_v37 = vsel %vm54_vm1, %v87_v36, -inf }
 0x175   :  { %89 = vmax.xlane.f32.xlu1 %v88_v37 }
 0x1fe   :  { %v104_v38 = vpop.xlane.xlu0 %103 }
 0x1ff   :  { %v105_v39 = vsub.f32 %v101_v32, %v104_v38 }
 0x201   :  { %v106_v40 = vmul.f32 1.442695, %v105_v39 }
 0x202   :  { %v90_v41 = vpop.xlane.xlu1 %89 }
 0x203   :  { %173 = vpow2.f32 %v106_v40  ;;  %v91_v42 = vsub.f32 %v87_v36, %v90_v41 }
 0x205   :  { %v92_v43 = vmul.f32 1.442695, %v91_v42 }
 0x207   :  { %175 = vpow2.f32 %v92_v43 }
 0x20d   :  { %v174_v44 = vpop.eup %173 }
 0x20e   :  { %v108_v45 = vsel %vm54_vm1, %v174_v44, 0.0 }
 0x20f   :  { %109 = vadd.xlane.f32.xlu0 %v108_v45 }
 0x211   :  { %v176_v46 = vpop.eup %175 }
 0x212   :  { %v94_v47 = vsel %vm54_vm1, %v176_v46, 0.0 }
 0x213   :  { %95 = vadd.xlane.f32.xlu1 %v94_v47 }
 0x29c   :  { %v110_v48 = vpop.xlane.xlu0 %109 }
 0x29d   :  { %177 = vlog2.f32 %v110_v48 }
 0x29e   :  { %179 = vrcp.f32 %v110_v48 }
 0x2a0   :  { %v96_v49 = vpop.xlane.xlu1 %95 }
 0x2a1   :  { %181 = vlog2.f32 %v96_v49 }
 0x2a7   :  { %v178_v50 = vpop.eup %177 }
 0x2a8   :  { %v180_v51 = vpop.eup %179  ;;  %v112_v53 = vmul.f32 0.6931472, %v178_v50 }
 0x2a9   :  { %v115_v52 = vmul.f32 %v180_v51, %v110_v48 }
 0x2aa   :  { %v113_v60 = vsub.f32 %v105_v39, %v112_v53 }
 0x2ab   :  { %v182_v55 = vpop.eup %181  ;;  %v116_v56 = vsub.f32 2.0, %v115_v52 }
 0x2ac   :  { %v98_v57 = vmul.f32 0.6931472, %v182_v55 }
 0x2ad   :  { %v117_v58 = vmul.f32 %v180_v51, %v116_v56 }
 0x2ae   :  { %v99_v59 = vsub.f32 %v91_v42, %v98_v57 }
 0x2af   :  { %v118_v61 = vmul.f32 %v174_v44, %v117_v58 }
 0x2b0   :  { %v119_v62 = vsub.f32 %v113_v60, %v99_v59 }
 0x2b2   :  { %v120_v63 = vmul.f32 %v119_v62, %v118_v61 }
 0x2b4   :  { %v122_v2 = vsel %vm121_vm3, %v120_v63, 0.0 }
 0x2b5   :  { %v124_v3 = vsel %vm54_vm1, %v122_v2, 0.0 }
 0x2b6   :  { %125 = vadd.xlane.f32.xlu0 %v124_v3 }
 0x343   :  { %v126_v0 = vpop.xlane.xlu0 %125 }
 0x344   :  { %v127_v5 = vrot.slane %v126_v0, 4 }
 0x346   :  { %v128_v6 = vadd.f32 %v127_v5, %v126_v0 }
 0x348   :  { %v129_v7 = vrot.slane %v128_v6, 2 }
 0x34a   :  { %v130_v8 = vadd.f32 %v129_v7, %v128_v6 }
 0x34c   :  { %v131_v9 = vrot.slane %v130_v8, 1 }
 0x34e   :  { %v132_v10 = vadd.f32 %v131_v9, %v130_v8 }
 0x350   :  { %159 = vpush %v132_v10 }
 0x381   :  { %s160_s1 = spop %159 }
 0x382   :  { %v134_v1 = vstv %s160_s1 }
 0x383   :  { %v135_v12 = vadd.f32 %v134_v1, %v123_v11 }
 0x385   :  { %137 = vst.msk [vmem:[#allocation7] sm:$0x1] %vm40_vm4, %v135_v12 }
 0x38c   :  { %v141_v13 = vld [vmem:[#allocation7] sm:$0x1] }
 0x38d   :  { %142 = vst.msk [vmem:[#allocation7] sm:$0x1] %vm40_vm4, %v141_v13 }
 0x38e   :  { %238 = shalt.err (!%p235_p6)
}
 0x38f   :  { %s239_s10 = scalar_lea.hbm %s339_s2, 16 }
 0x390   :  { %p240_p7 = scmp.ne.s32.totalorder %s339_s2, %s239_s10  ;;  %p243_p8 = scmp.lt.u32.totalorder %s239_s10, %s339_s2 }
 0x392   :  { %p245_p9 = pnand %p243_p8, %p240_p7 }
 0x394   :  { %248 = shalt.err (!%p245_p9)
}
 0x395   :  { %152 = dma.vmem_to_hbm [thread:$0]  %s150_s5, 16, %s339_s2, [#allocation4]  }
 0x396   :  { %253 = dma.done.wait [#allocation4], 16  }
 0x397   :  { %254 = vsyncadd [#allocation4], 4294967280 }
 0x398   :  { %156 = vsyncpa [#allocation3], 1 }
 0x399   :  { %157 = vsyncpa [#allocation6], 1 }
 0x39a   :  { %158 = vsyncpa [#allocation4], 1 }

</bundles_post_ra>
